<compile_context>
chip_gen: v5e
topology: v5e:2x2
jax: 0.10.0
libtpu: 0.0.40
codegen_flags: <defaults>
</compile_context>

<pallas_src>
import functools

import jax
import jax.numpy as jnp
from jax.experimental import pallas as pl
from jax.experimental.pallas import tpu as pltpu

_LANE = 128


def _round_up(x, m):
    return (x + m - 1) // m * m


# ----------------------------------------------------------------------------
# Kernel: whole encoder fused.  refs = (x, w0, b0, w1, b1, ..., out)
# ----------------------------------------------------------------------------
def _fused_encoder_kernel(num_layers, *refs):
    x_ref, o_ref = refs[0], refs[-1]
    h = x_ref[...]                                   # (tile_m, in_dim)
    for i in range(num_layers):
        w = refs[1 + 2 * i][...]                     # (k_i, n_i), pre-transposed
        b = refs[2 + 2 * i][...]                     # (1, n_i)
        h = jnp.dot(h, w, preferred_element_type=jnp.float32) + b
        h = jnp.maximum(h, 0.0)                      # ReLU on every stage (spec)
    o_ref[...] = h.astype(o_ref.dtype)


# ----------------------------------------------------------------------------
# Wrapper: single pallas_call, grid over rows.
# ----------------------------------------------------------------------------
def rq_encoder_fused(x2, kernel_params, *, max_tile_m=512):
    """x2: (M, input_dim) f32.  kernel_params: flat tuple
    (w0_t, b0, w1_t, b1, ...) with w_t in (in, out) layout, b in (1, out)."""
    num_layers = len(kernel_params) // 2
    M, K = x2.shape
    n_out = kernel_params[-1].shape[-1]

    # Row tile: multiple of 8 sublanes, capped; pad rows up to a tile multiple.
    tile_m = min(max_tile_m, _round_up(max(M, 1), 8))
    m_pad = _round_up(M, tile_m)
    x_in = x2 if m_pad == M else jnp.pad(x2, ((0, m_pad - M), (0, 0)))

    # Activation tile streams over the grid; weights/biases stay resident.
    in_specs = [pl.BlockSpec((tile_m, K), lambda i: (i, 0))]
    for li in range(num_layers):
        k_in, n = kernel_params[2 * li].shape
        in_specs.append(pl.BlockSpec((k_in, n), lambda i: (0, 0)))
        in_specs.append(pl.BlockSpec((1, n), lambda i: (0, 0)))

    out = pl.pallas_call(
        functools.partial(_fused_encoder_kernel, num_layers),
        out_shape=jax.ShapeDtypeStruct((m_pad, n_out), x2.dtype),
        grid=(m_pad // tile_m,),
        in_specs=in_specs,
        out_specs=pl.BlockSpec((tile_m, n_out), lambda i: (i, 0)),
        compiler_params=pltpu.CompilerParams(
            dimension_semantics=("parallel",)),
    )(x_in, *kernel_params)
    return out if m_pad == M else out[:M]


@jax.jit
def rq_encoder_forward(x, kernel_params):
    """Forward of RQEncoder: Linear+ReLU stages over the last dim."""
    orig_shape = x.shape
    x2 = x.reshape(-1, orig_shape[-1])               # flatten leading dims (glue)
    y2 = rq_encoder_fused(x2, kernel_params)         # single fused kernel
    return y2.reshape(orig_shape[:-1] + (y2.shape[-1],))


# ----------------------------------------------------------------------------
# Parameter init (PyTorch Linear convention) + one-time kernel-layout prep.
# ----------------------------------------------------------------------------
def init_rq_encoder_params(key, input_dim, hidden_channels, latent_dim):
    """PyTorch-style Linear init: weight (out, in), bias (out,),
    uniform(-1/sqrt(fan_in), +1/sqrt(fan_in))."""
    dims = [input_dim] + list(hidden_channels) + [latent_dim]
    params = []
    for i in range(len(dims) - 1):
        in_dim, out_dim = dims[i], dims[i + 1]
        key, kw, kb = jax.random.split(key, 3)
        bound = 1.0 / (in_dim ** 0.5)
        w = jax.random.uniform(kw, (out_dim, in_dim), jnp.float32, -bound, bound)
        b = jax.random.uniform(kb, (out_dim,), jnp.float32, -bound, bound)
        params.append((w, b))
    return params


def prepare_kernel_params(torch_params):
    """Once, outside the hot path: transpose weights to (in, out), reshape
    biases to (1, out), and zero-pad intermediate hidden widths to multiples
    of 128 lanes.  The final (latent) width is left unpadded so the kernel
    output shape matches the module's output exactly."""
    n = len(torch_params)
    flat = []
    prev_out_pad = None
    for li, (w, b) in enumerate(torch_params):
        out_dim, in_dim = w.shape
        in_pad = in_dim if li == 0 else prev_out_pad
        out_pad = out_dim if li == n - 1 else _round_up(out_dim, _LANE)
        w_t = jnp.zeros((in_pad, out_pad), w.dtype).at[:in_dim, :out_dim].set(w.T)
        b2 = jnp.zeros((1, out_pad), b.dtype).at[0, :out_dim].set(b)
        flat += [w_t, b2]
        prev_out_pad = out_pad
    return tuple(flat)


if __name__ == "__main__":
    # Small shapes consistent with the module: Linear acts over the last dim.
    batch_shape = (2, 4)          # leading dims -> flattened to 8 rows
    input_dim = 32
    hidden_channels = [64, 48]
    latent_dim = 16

    key = jax.random.PRNGKey(0)
    key, kx = jax.random.split(key)
    x = jax.random.normal(kx, batch_shape + (input_dim,), jnp.float32)

    torch_params = init_rq_encoder_params(key, input_dim, hidden_channels,
                                          latent_dim)
    kernel_params = prepare_kernel_params(torch_params)   # outside jit, once

    out = rq_encoder_forward(x, kernel_params)
    out = jax.block_until_ready(out)

    # Pure-JAX reference in the original PyTorch layout (ReLU after every
    # Linear, including the last one, per the module spec).
    ref = x.reshape(-1, input_dim)
    for w, b in torch_params:
        ref = jnp.maximum(ref @ w.T + b, 0.0)
    ref = ref.reshape(batch_shape + (latent_dim,))

    assert out.shape == batch_shape + (latent_dim,)
    assert jnp.allclose(out, ref, atol=1e-5, rtol=1e-5)

    print("KERNEL_OK")
</pallas_src>

<mosaic_0001>
module attributes {stable_mosaic.version = 11 : i64} {
  func.func @_fused_encoder_kernel(%arg0: i32, %arg1: memref<8x32xf32, #tpu.memory_space<vmem>>, %arg2: memref<32x128xf32, #tpu.memory_space<vmem>>, %arg3: memref<1x128xf32, #tpu.memory_space<vmem>>, %arg4: memref<128x128xf32, #tpu.memory_space<vmem>>, %arg5: memref<1x128xf32, #tpu.memory_space<vmem>>, %arg6: memref<128x16xf32, #tpu.memory_space<vmem>>, %arg7: memref<1x16xf32, #tpu.memory_space<vmem>>, %arg8: memref<8x16xf32, #tpu.memory_space<vmem>>) attributes {dimension_semantics = [#tpu.dimension_semantics<parallel>], iteration_bounds = array<i64: 1>, scalar_prefetch = 0 : i64, scratch_operands = 0 : i64, tpu.core_type = #tpu.core_type<tc>, window_params = [{transform_indices = @transform_0, window_bounds = array<i64: 8, 32>}, {pipeline_mode = #tpu.pipeline_mode<synchronous>, transform_indices = @transform_1, window_bounds = array<i64: 32, 128>}, {pipeline_mode = #tpu.pipeline_mode<synchronous>, transform_indices = @transform_2, window_bounds = array<i64: 1, 128>}, {pipeline_mode = #tpu.pipeline_mode<synchronous>, transform_indices = @transform_3, window_bounds = array<i64: 128, 128>}, {pipeline_mode = #tpu.pipeline_mode<synchronous>, transform_indices = @transform_4, window_bounds = array<i64: 1, 128>}, {pipeline_mode = #tpu.pipeline_mode<synchronous>, transform_indices = @transform_5, window_bounds = array<i64: 128, 16>}, {pipeline_mode = #tpu.pipeline_mode<synchronous>, transform_indices = @transform_6, window_bounds = array<i64: 1, 16>}, {transform_indices = @transform_7, window_bounds = array<i64: 8, 16>}]} {
    %c0 = arith.constant 0 : index
    %c0_0 = arith.constant 0 : index
    %0 = vector.load %arg1[%c0, %c0_0] : memref<8x32xf32, #tpu.memory_space<vmem>>, vector<8x32xf32>
    %c0_1 = arith.constant 0 : index
    %c0_2 = arith.constant 0 : index
    %1 = vector.load %arg2[%c0_1, %c0_2] : memref<32x128xf32, #tpu.memory_space<vmem>>, vector<32x128xf32>
    %c0_3 = arith.constant 0 : index
    %c0_4 = arith.constant 0 : index
    %2 = vector.load %arg3[%c0_3, %c0_4] : memref<1x128xf32, #tpu.memory_space<vmem>>, vector<1x128xf32>
    %cst = arith.constant dense<0.000000e+00> : vector<8x128xf32>
    %3 = tpu.matmul %0, %1, %cst {dimension_numbers = #tpu.dot_dimension_numbers<[1], [0], [0], [1], [0, 0, 1, 1], [], []>} : vector<8x32xf32>, vector<32x128xf32>, vector<8x128xf32> -> vector<8x128xf32>
    %4 = vector.broadcast %2 : vector<1x128xf32> to vector<8x128xf32>
    %5 = arith.addf %3, %4 : vector<8x128xf32>
    %cst_5 = arith.constant 0.000000e+00 : f32
    %6 = vector.broadcast %cst_5 : f32 to vector<8x128xf32>
    %7 = arith.maximumf %5, %6 : vector<8x128xf32>
    %c0_6 = arith.constant 0 : index
    %c0_7 = arith.constant 0 : index
    %8 = vector.load %arg4[%c0_6, %c0_7] : memref<128x128xf32, #tpu.memory_space<vmem>>, vector<128x128xf32>
    %c0_8 = arith.constant 0 : index
    %c0_9 = arith.constant 0 : index
    %9 = vector.load %arg5[%c0_8, %c0_9] : memref<1x128xf32, #tpu.memory_space<vmem>>, vector<1x128xf32>
    %cst_10 = arith.constant dense<0.000000e+00> : vector<8x128xf32>
    %10 = tpu.matmul %7, %8, %cst_10 {dimension_numbers = #tpu.dot_dimension_numbers<[1], [0], [0], [1], [0, 0, 1, 1], [], []>} : vector<8x128xf32>, vector<128x128xf32>, vector<8x128xf32> -> vector<8x128xf32>
    %11 = vector.broadcast %9 : vector<1x128xf32> to vector<8x128xf32>
    %12 = arith.addf %10, %11 : vector<8x128xf32>
    %cst_11 = arith.constant 0.000000e+00 : f32
    %13 = vector.broadcast %cst_11 : f32 to vector<8x128xf32>
    %14 = arith.maximumf %12, %13 : vector<8x128xf32>
    %c0_12 = arith.constant 0 : index
    %c0_13 = arith.constant 0 : index
    %15 = vector.load %arg6[%c0_12, %c0_13] : memref<128x16xf32, #tpu.memory_space<vmem>>, vector<128x16xf32>
    %c0_14 = arith.constant 0 : index
    %c0_15 = arith.constant 0 : index
    %16 = vector.load %arg7[%c0_14, %c0_15] : memref<1x16xf32, #tpu.memory_space<vmem>>, vector<1x16xf32>
    %cst_16 = arith.constant dense<0.000000e+00> : vector<8x16xf32>
    %17 = tpu.matmul %14, %15, %cst_16 {dimension_numbers = #tpu.dot_dimension_numbers<[1], [0], [0], [1], [0, 0, 1, 1], [], []>} : vector<8x128xf32>, vector<128x16xf32>, vector<8x16xf32> -> vector<8x16xf32>
    %18 = vector.broadcast %16 : vector<1x16xf32> to vector<8x16xf32>
    %19 = arith.addf %17, %18 : vector<8x16xf32>
    %cst_17 = arith.constant 0.000000e+00 : f32
    %20 = vector.broadcast %cst_17 : f32 to vector<8x16xf32>
    %21 = arith.maximumf %19, %20 : vector<8x16xf32>
    %c0_18 = arith.constant 0 : index
    %c0_19 = arith.constant 0 : index
    %22 = vector.load %arg8[%c0_18, %c0_19] : memref<8x16xf32, #tpu.memory_space<vmem>>, vector<8x16xf32>
    tpu.vector_store %arg8[%c0_18, %c0_19], %21 {strides = array<i32>} : memref<8x16xf32, #tpu.memory_space<vmem>>, vector<8x16xf32>,
    return
  }
  func.func @transform_0(%arg0: i32) -> (i32, i32) {
    %c0_i32 = arith.constant 0 : i32
    %c0_i32_0 = arith.constant 0 : i32
    return %arg0, %c0_i32 : i32, i32
  }
  func.func @transform_1(%arg0: i32) -> (i32, i32) {
    %c0_i32 = arith.constant 0 : i32
    %c0_i32_0 = arith.constant 0 : i32
    %c0_i32_1 = arith.constant 0 : i32
    return %c0_i32, %c0_i32_0 : i32, i32
  }
  func.func @transform_2(%arg0: i32) -> (i32, i32) {
    %c0_i32 = arith.constant 0 : i32
    %c0_i32_0 = arith.constant 0 : i32
    %c0_i32_1 = arith.constant 0 : i32
    return %c0_i32, %c0_i32_0 : i32, i32
  }
  func.func @transform_3(%arg0: i32) -> (i32, i32) {
    %c0_i32 = arith.constant 0 : i32
    %c0_i32_0 = arith.constant 0 : i32
    %c0_i32_1 = arith.constant 0 : i32
    return %c0_i32, %c0_i32_0 : i32, i32
  }
  func.func @transform_4(%arg0: i32) -> (i32, i32) {
    %c0_i32 = arith.constant 0 : i32
    %c0_i32_0 = arith.constant 0 : i32
    %c0_i32_1 = arith.constant 0 : i32
    return %c0_i32, %c0_i32_0 : i32, i32
  }
  func.func @transform_5(%arg0: i32) -> (i32, i32) {
    %c0_i32 = arith.constant 0 : i32
    %c0_i32_0 = arith.constant 0 : i32
    %c0_i32_1 = arith.constant 0 : i32
    return %c0_i32, %c0_i32_0 : i32, i32
  }
  func.func @transform_6(%arg0: i32) -> (i32, i32) {
    %c0_i32 = arith.constant 0 : i32
    %c0_i32_0 = arith.constant 0 : i32
    %c0_i32_1 = arith.constant 0 : i32
    return %c0_i32, %c0_i32_0 : i32, i32
  }
  func.func @transform_7(%arg0: i32) -> (i32, i32) {
    %c0_i32 = arith.constant 0 : i32
    %c0_i32_0 = arith.constant 0 : i32
    return %arg0, %c0_i32 : i32, i32
  }
}

</mosaic_0001>

<bundles_post_ra>
// kernel: rq_encoder_forward.1
= control target key start
LH: loop header
LB: loop body
LE: loop exit
PB: predicated region body
PF: predicated region fallthrough
CT: control target
= control target key end

     0   :  { %12 = vsyncpa [#allocation3], 0  ;;  %s396_s0 = inlined_call_operand.vmem [shape: f32[8,32], index: 0, kind: input, shape index: {}]   ;;  %s397_s1 = inlined_call_operand.hbm [shape: f32[32,128], index: 1, kind: input, shape index: {}]   ;;  %s398_s2 = inlined_call_operand.vmem [shape: f32[1,128], index: 2, kind: input, shape index: {}]   ;;  %s399_s3 = inlined_call_operand.vmem [shape: f32[128,128], index: 3, kind: input, shape index: {}]   ;;  %s400_s4 = inlined_call_operand.vmem [shape: f32[1,128], index: 4, kind: input, shape index: {}]   ;;  %s401_s5 = inlined_call_operand.vmem [shape: f32[128,16], index: 5, kind: input, shape index: {}]   ;;  %s402_s6 = inlined_call_operand.vmem [shape: f32[1,16], index: 6, kind: input, shape index: {}]   ;;  %s403_s7 = inlined_call_operand.hbm [shape: f32[8,16], index: 7, kind: output, shape index: {}]  }
   0x1   :  { %13 = vsyncpa [#allocation4], 0  ;;  %s20_s26 = sshll.u32 %s397_s1, 4  ;;  %s238_s27 = smov [#allocation2]   ;;  %s21_s26 = int_to_ptr.hbm [resolvable:$true] %s20_s26 }
   0x2   :  { %s22_s28 = sshll.u32 %s238_s27, 4  ;;  %s239_s29 = smov 128   ;;  %s23_s28 = int_to_ptr.vmem [resolvable:$true] %s22_s28 }
   0x3   :  { %s240_s30 = smov 8  }
   0x4   :  { %28 = dma.hbm_to_vmem [thread:$0]  %s21_s26, 512, %s23_s28, [#allocation3], %s239_s29, %s239_s29, %s240_s30  }
   0x5   :  { %234 = dma.done.wait [#allocation3], 512  }
   0x6   :  { %235 = vsyncadd [#allocation3], 4294966784  ;;  %v47_v0 = vld [vmem:[#allocation2 + $0x18] sm:$0xff]  ;;  %v46_v1 = vld [vmem:[#allocation2 + $0x10] sm:$0xff]  ;;  %vm52_vm0 = vcmask 261120   ;;  %s241_s25 = smov [#allocation5]  }
   0x7   :  { %68 = vmatpush.msra.mxu0 %v47_v0  ;;  %v92_v2 = vld [vmem:[%s399_s3 + $0x78] sm:$0xff]  ;;  %v45_v3 = vld [vmem:[#allocation2 + $0x8] sm:$0xff]  ;;  %v91_v4 = vld [vmem:[%s399_s3 + $0x70] sm:$0xff]  ;;  %s166_s26 = sshll.u32 %s241_s25, 4  ;;  %vm159_vm1 = vcmask 130048   ;;  %s167_s26 = int_to_ptr.vmem [resolvable:$true] %s166_s26 }
   0x8   :  { %97 = vmatpush.msra.mxu1 %v92_v2  ;;  %v90_v5 = vld [vmem:[%s399_s3 + $0x68] sm:$0xff]  ;;  %v44_v6 = vld [vmem:[#allocation2] sm:$0xff]  ;;  %v88_v9 = vld [vmem:[%s399_s3 + $0x58] sm:$0xff] }
   0x9   :  { %69 = vmatpush.msra.mxu0 %v46_v1  ;;  %v43_v7 = vld [vmem:[%s396_s0] sm:$0xff]  ;;  %v87_v10 = vld [vmem:[%s399_s3 + $0x50] sm:$0xff]  ;;  %v86_v11 = vld [vmem:[%s399_s3 + $0x48] sm:$0xff] }
   0xa   :  { %98 = vmatpush.msra.mxu1 %v91_v4  ;;  %v89_v8 = vld [vmem:[%s399_s3 + $0x60] sm:$0xff]  ;;  %v84_v13 = vld [vmem:[%s399_s3 + $0x38] sm:$0xff]  ;;  %v83_v14 = vld [vmem:[%s399_s3 + $0x30] sm:$0xff] }
   0xb   :  { %70 = vmatpush.msra.mxu0 %v45_v3  ;;  %v85_v12 = vld [vmem:[%s399_s3 + $0x40] sm:$0xff]  ;;  %v82_v15 = vld [vmem:[%s399_s3 + $0x28] sm:$0xff]  ;;  %v80_v17 = vld [vmem:[%s399_s3 + $0x18] sm:$0xff] }
   0xc   :  { %99 = vmatpush.msra.mxu1 %v90_v5  ;;  %v81_v16 = vld [vmem:[%s399_s3 + $0x20] sm:$0xff]  ;;  %v79_v18 = vld [vmem:[%s399_s3 + $0x10] sm:$0xff]  ;;  %v78_v19 = vld [vmem:[%s399_s3 + $0x8] sm:$0xff] }
   0xd   :  { %71 = vmatpush.msra.mxu0 %v44_v6  ;;  %v77_v20 = vld [vmem:[%s399_s3] sm:$0xff]  ;;  %v133_v21 = vld [vmem:[%s401_s5 + $0x78] sm:$0xff]  ;;  %v132_v22 = vld [vmem:[%s401_s5 + $0x70] sm:$0xff] }
   0xe   :  { %178 = vmatmul.msk.f32.vlgmr.msra.gmra.mxu0 %vm52_vm0, %v43_v7  ;;  %100 = vmatpush.msra.mxu1 %v89_v8  ;;  %v131_v23 = vld [vmem:[%s401_s5 + $0x68] sm:$0xff]  ;;  %v130_v24 = vld [vmem:[%s401_s5 + $0x60] sm:$0xff]  ;;  %v129_v25 = vld [vmem:[%s401_s5 + $0x58] sm:$0xff] }
   0xf   :  { %138 = vmatpush.msra.mxu2 %v133_v21  ;;  %v128_v26 = vld [vmem:[%s401_s5 + $0x50] sm:$0xff]  ;;  %v127_v27 = vld [vmem:[%s401_s5 + $0x48] sm:$0xff]  ;;  %v126_v28 = vld [vmem:[%s401_s5 + $0x40] sm:$0xff] }
  0x10   :  { %101 = vmatpush.msra.mxu1 %v88_v9  ;;  %v125_v29 = vld [vmem:[%s401_s5 + $0x38] sm:$0xff]  ;;  %v124_v30 = vld [vmem:[%s401_s5 + $0x30] sm:$0xff]  ;;  %v123_v31 = vld [vmem:[%s401_s5 + $0x28] sm:$0xff] }
  0x11   :  { %139 = vmatpush.msra.mxu2 %v132_v22  ;;  %v122_v32 = vld [vmem:[%s401_s5 + $0x20] sm:$0xff]  ;;  %v121_v33 = vld [vmem:[%s401_s5 + $0x18] sm:$0xff]  ;;  %v120_v38 = vld [vmem:[%s401_s5 + $0x10] sm:$0xff] }
  0x12   :  { %102 = vmatpush.msra.mxu1 %v87_v10  ;;  %v183_v34 = vld [vmem:[%s398_s2] ss:$0 sm:$0xff]  ;;  %v119_v39 = vld [vmem:[%s401_s5 + $0x8] sm:$0xff] }
  0x13   :  { %140 = vmatpush.msra.mxu2 %v131_v23  ;;  %v118_v40 = vld [vmem:[%s401_s5] sm:$0xff]  ;;  %s168_s5 = sshll.u32 %s403_s7, 4  ;;  %s169_s5 = int_to_ptr.hbm [resolvable:$true] %s168_s5 }
  0x14   :  { %103 = vmatpush.msra.mxu1 %v86_v11  ;;  %v184_v41 = vld [vmem:[%s400_s4] ss:$0 sm:$0xff] }
  0x15   :  { %141 = vmatpush.msra.mxu2 %v130_v24  ;;  %v185_v45 = vld [vmem:[%s402_s6] ss:$0 sm:$0xff] }
  0x16   :  { %104 = vmatpush.msra.mxu1 %v85_v12 }
  0x17   :  { %142 = vmatpush.msra.mxu2 %v129_v25 }
  0x18   :  { %105 = vmatpush.msra.mxu1 %v84_v13 }
  0x19   :  { %143 = vmatpush.msra.mxu2 %v128_v26 }
  0x1a   :  { %106 = vmatpush.msra.mxu1 %v83_v14 }
  0x1b   :  { %144 = vmatpush.msra.mxu2 %v127_v27 }
  0x1c   :  { %107 = vmatpush.msra.mxu1 %v82_v15 }
  0x1d   :  { %145 = vmatpush.msra.mxu2 %v126_v28 }
  0x1e   :  { %108 = vmatpush.msra.mxu1 %v81_v16 }
  0x1f   :  { %146 = vmatpush.msra.mxu2 %v125_v29 }
  0x20   :  { %109 = vmatpush.msra.mxu1 %v80_v17 }
  0x21   :  { %147 = vmatpush.msra.mxu2 %v124_v30 }
  0x22   :  { %110 = vmatpush.msra.mxu1 %v79_v18 }
  0x23   :  { %148 = vmatpush.msra.mxu2 %v123_v31 }
  0x24   :  { %111 = vmatpush.msra.mxu1 %v78_v19 }
  0x25   :  { %149 = vmatpush.msra.mxu2 %v122_v32 }
  0x26   :  { %112 = vmatpush.msra.mxu1 %v77_v20 }
  0x27   :  { %150 = vmatpush.msra.mxu2 %v121_v33 }
  0x29   :  { %151 = vmatpush.msra.mxu2 %v120_v38 }
  0x2b   :  { %152 = vmatpush.msra.mxu2 %v119_v39 }
  0x2d   :  { %153 = vmatpush.msra.mxu2 %v118_v40 }
  0x8b   :  { %v73_v35 = vpop.f32.mrf.mxu0 }
  0x8c   :  { %v74_v36 = vadd.f32 %v183_v34, %v73_v35 }
  0x8e   :  { %v76_v37 = vmax.f32 %v74_v36, 0.0 }
  0x90   :  { %113 = vmatmul.f32.vlgmr.msra.gmra.mxu1 %v76_v37 }
 0x10d   :  { %v114_v42 = vpop.f32.mrf.mxu1 }
 0x10e   :  { %v115_v43 = vadd.f32 %v184_v41, %v114_v42 }
 0x110   :  { %v117_v44 = vmax.f32 %v115_v43, 0.0 }
 0x112   :  { %154 = vmatmul.f32.vlgmr.msra.gmra.mxu2 %v117_v44 }
 0x195   :  { %v155_v46 = vpop.f32.mrf.mxu2 }
 0x196   :  { %v156_v47 = vadd.f32 %v185_v45, %v155_v46 }
 0x198   :  { %v158_v48 = vmax.f32 %v156_v47, 0.0 }
 0x19a   :  { %160 = vst.msk [vmem:[#allocation5] sm:$0xff] %vm159_vm1, %v158_v48 }
 0x19b   :  { %171 = dma.vmem_to_hbm [thread:$0]  %s167_s26, 128, %s169_s5, [#allocation4]  }
 0x19c   :  { %236 = dma.done.wait [#allocation4], 128  }
 0x19d   :  { %237 = vsyncadd [#allocation4], 4294967168 }
 0x19e   :  { %176 = vsyncpa [#allocation3], 1 }
 0x19f   :  { %177 = vsyncpa [#allocation4], 1 }

</bundles_post_ra>
